<compile_context>
chip_gen: v7x
topology: tpu7x:2x2x1
jax: 0.10.0
libtpu: 0.0.40
codegen_flags: <defaults>
</compile_context>

<pallas_src>
import math

import jax
import jax.numpy as jnp
from jax.experimental import pallas as pl
from jax.experimental.pallas import tpu as pltpu


def make_positional_encoding(d_model: int, max_len: int = 5000) -> jnp.ndarray:
    """Deterministic buffer init, mirrors nn.Module.__init__ (odd d_model safe)."""
    position = jnp.arange(0, max_len, dtype=jnp.float32)[:, None]          # (max_len, 1)
    div_term = jnp.exp(
        jnp.arange(0, d_model, 2, dtype=jnp.float32) * (-math.log(10000.0) / d_model)
    )                                                                       # (ceil(d/2),)
    angles = position * div_term                                            # (max_len, ceil(d/2))
    pe = jnp.zeros((max_len, d_model), dtype=jnp.float32)
    pe = pe.at[:, 0::2].set(jnp.sin(angles))
    # cos side has floor(d/2) columns; slice so odd d_model does not shape-error.
    pe = pe.at[:, 1::2].set(jnp.cos(angles)[:, : d_model // 2])
    return pe[None, :, :]                                                   # (1, max_len, d_model)


def _pe_add_kernel(x_ref, pe_ref, o_ref):
    # pe may arrive in its storage dtype (f32) while x is e.g. bf16; the cast is
    # a VPU op that is free in this memory-bound kernel and avoids a separate
    # wrapper-side cast pass through HBM.
    o_ref[...] = x_ref[...] + pe_ref[...].astype(x_ref.dtype)


# Below this total input size a single un-gridded invocation beats any tiling
# (~0.35 us per grid step would dominate).
_FAST_PATH_MAX_BYTES = 256 * 1024
# ~2 MiB per block: 3 arrays x 2 double-buffers = 12 MiB.  >=4096 rows x 128
# lanes f32 sits well past the HBM-roofline knee measured at ~512 rows.
_TILE_TARGET_BYTES = 2 * 1024 * 1024
# Headroom over the v5e 16 MiB scoped default; equals the v6e/v7x default and
# is far below every generation's physical VMEM.
_VMEM_LIMIT_BYTES = 32 * 1024 * 1024


def positional_encoding_forward(
    x: jnp.ndarray,
    pe: jnp.ndarray,
    *,
    fast_path_max_bytes: int = _FAST_PATH_MAX_BYTES,
    tile_target_bytes: int = _TILE_TARGET_BYTES,
) -> jnp.ndarray:
    """x: (B, S, D); pe: (1, max_len, D). Returns x + pe[:, :S] (in x.dtype)."""
    B, S, D = x.shape
    if pe.ndim != 3 or pe.shape[0] != 1 or pe.shape[2] != D:
        raise ValueError(f"pe must have shape (1, max_len, {D}); got {pe.shape}")
    max_len = pe.shape[1]
    if S > max_len:
        raise ValueError(f"seq_len {S} exceeds positional-encoding max_len {max_len}")

    x_itemsize = jnp.dtype(x.dtype).itemsize
    total_bytes = B * S * D * x_itemsize

    # ---------------- tiny-input fast path: one whole-array invocation -------
    if total_bytes <= fast_path_max_bytes:
        pe_slice = pe[:, :S, :].astype(x.dtype)        # negligible at this size
        cost = pl.CostEstimate(
            flops=B * S * D,
            transcendentals=0,
            bytes_accessed=2 * B * S * D * x_itemsize + S * D * x_itemsize,
        )
        return pl.pallas_call(
            _pe_add_kernel,
            out_shape=jax.ShapeDtypeStruct((B, S, D), x.dtype),
            cost_estimate=cost,
        )(x, pe_slice)

    # ---------------- large path: lane-dense, row-tiled elementwise add ------
    lane_dense = (S * D) % 128 == 0
    if lane_dense:
        # Free (contiguous) reshape: every store becomes an unmasked full-width
        # vst regardless of d_model.
        R, C = (S * D) // 128, 128
        x_in = x.reshape(B, R, C)
        pe_full_ok = (max_len * D) % 128 == 0          # can full pe be reshaped too?
        pe_full_rows = (max_len * D) // 128 if pe_full_ok else 0
    else:
        # Rare odd-shape fallback: tile the sequence axis directly (stores may
        # be lane-masked if D < 128, but semantics are unchanged).
        R, C = S, D
        x_in = x
        pe_full_ok = True                              # pe already (1, max_len, D)
        pe_full_rows = max_len

    rows_per_tile = max(8, (tile_target_bytes // max(1, C * x_itemsize)) // 8 * 8)
    rows_per_tile = min(rows_per_tile, R)              # == R (full dim) if R is small
    n_row_tiles = pl.cdiv(R, rows_per_tile)

    # Use the full pe buffer (no wrapper slice/cast copy) whenever the (8,128)
    # BlockSpec rule is satisfied on it: row-block multiple of 8, or block
    # spanning the entire pe row dim.  The index_map only ever selects row
    # blocks covering [0, R); a partial last x/out block discards any rows >= R.
    use_full_pe = pe_full_ok and (rows_per_tile % 8 == 0 or rows_per_tile == pe_full_rows)
    if use_full_pe:
        pe_in = pe.reshape(1, pe_full_rows, C) if lane_dense else pe   # free bitcast
    else:
        pe_in = pe[:, :S, :].astype(x.dtype)
        if lane_dense:
            pe_in = pe_in.reshape(1, R, C)

    pe_itemsize = jnp.dtype(pe_in.dtype).itemsize
    cost = pl.CostEstimate(
        flops=B * S * D,
        transcendentals=0,
        bytes_accessed=2 * B * S * D * x_itemsize + S * D * pe_itemsize,
    )

    # Single flattened grid axis, row-tile major / batch minor:
    #   g -> (batch = g % B, row_tile = g // B)
    # "parallel" lets the megacore split load-balance even for B == 1;
    # batch-minor ordering keeps the pe block index constant across consecutive
    # steps so Pallas fetches each pe tile once instead of once per batch.
    grid = (n_row_tiles * B,)

    out = pl.pallas_call(
        _pe_add_kernel,
        out_shape=jax.ShapeDtypeStruct((B, R, C), x.dtype),
        grid_spec=pltpu.PrefetchScalarGridSpec(
            num_scalar_prefetch=0,
            grid=grid,
            in_specs=[
                pl.BlockSpec((1, rows_per_tile, C), lambda g: (g % B, g // B, 0)),
                pl.BlockSpec((1, rows_per_tile, C), lambda g: (0, g // B, 0)),
            ],
            out_specs=pl.BlockSpec((1, rows_per_tile, C), lambda g: (g % B, g // B, 0)),
        ),
        compiler_params=pltpu.CompilerParams(
            dimension_semantics=("parallel",),
            vmem_limit_bytes=_VMEM_LIMIT_BYTES,
        ),
        cost_estimate=cost,
    )(x_in, pe_in)
    return out.reshape(B, S, D)

    # TODO(synk): optional further win for B==1 / huge S: generate pe in-kernel
    # (iota + sin/cos on idle EUP/VPU slots) to remove the pe HBM read entirely.


if __name__ == "__main__":
    key = jax.random.PRNGKey(0)

    # 1) Small shapes consistent with the module: batch=2, seq=8, d_model=32.
    B, S, D = 2, 8, 32
    pe = make_positional_encoding(D, max_len=64)
    x = jax.random.normal(key, (B, S, D), dtype=jnp.float32)
    out = jax.block_until_ready(positional_encoding_forward(x, pe))
    ref = x + pe[:, :S, :]
    assert out.shape == (B, S, D)
    assert jnp.allclose(out, ref, atol=1e-6), "fast-path mismatch vs reference"

    # 2) Lane-dense tiled path with FULL-pe (no wrapper slice), forced via tiny
    #    thresholds; non-divisible last row tile: S*D = 19200 -> (B, 150, 128).
    B2, S2, D2 = 2, 200, 96
    pe2 = make_positional_encoding(D2, max_len=256)
    x2 = jax.random.normal(jax.random.PRNGKey(0), (B2, S2, D2), dtype=jnp.float32)
    out2 = jax.block_until_ready(
        positional_encoding_forward(
            x2, pe2, fast_path_max_bytes=0, tile_target_bytes=32 * 1024
        )
    )
    ref2 = x2 + pe2[:, :S2, :]
    assert jnp.allclose(out2, ref2, atol=1e-6), "tiled lane-dense full-pe path mismatch"

    # 3) Odd-shape fallback path (S*D not a multiple of 128, d_model < 128).
    B3, S3, D3 = 2, 24, 20
    pe3 = make_positional_encoding(D3, max_len=32)
    x3 = jax.random.normal(jax.random.PRNGKey(0), (B3, S3, D3), dtype=jnp.float32)
    out3 = jax.block_until_ready(
        positional_encoding_forward(
            x3, pe3, fast_path_max_bytes=0, tile_target_bytes=32 * 1024
        )
    )
    ref3 = x3 + pe3[:, :S3, :]
    assert jnp.allclose(out3, ref3, atol=1e-6), "fallback path mismatch"

    # 4) Lane-dense path where full-pe reshape is impossible (max_len*D % 128 != 0)
    #    -> exercises the pre-sliced pe branch.
    B4, S4, D4 = 2, 200, 96
    pe4 = make_positional_encoding(D4, max_len=250)
    x4 = jax.random.normal(jax.random.PRNGKey(0), (B4, S4, D4), dtype=jnp.float32)
    out4 = jax.block_until_ready(
        positional_encoding_forward(
            x4, pe4, fast_path_max_bytes=0, tile_target_bytes=32 * 1024
        )
    )
    ref4 = x4 + pe4[:, :S4, :]
    assert jnp.allclose(out4, ref4, atol=1e-6), "tiled lane-dense sliced-pe path mismatch"

    # 5) bf16 activations + f32 pe buffer: in-kernel cast path.
    B5, S5, D5 = 2, 128, 64
    pe5 = make_positional_encoding(D5, max_len=256)
    x5 = jax.random.normal(jax.random.PRNGKey(0), (B5, S5, D5), dtype=jnp.bfloat16)
    out5 = jax.block_until_ready(
        positional_encoding_forward(
            x5, pe5, fast_path_max_bytes=0, tile_target_bytes=16 * 1024
        )
    )
    ref5 = x5 + pe5[:, :S5, :].astype(jnp.bfloat16)
    assert out5.dtype == jnp.bfloat16
    assert jnp.allclose(
        out5.astype(jnp.float32), ref5.astype(jnp.float32), atol=1e-2
    ), "bf16 in-kernel-cast path mismatch"

    print("KERNEL_OK")
</pallas_src>

<mosaic_0001>
module attributes {stable_mosaic.version = 11 : i64} {
  func.func @_pe_add_kernel(%arg0: memref<2x8x32xf32, #tpu.memory_space<vmem>>, %arg1: memref<1x8x32xf32, #tpu.memory_space<vmem>>, %arg2: memref<2x8x32xf32, #tpu.memory_space<vmem>>) attributes {dimension_semantics = [], scalar_prefetch = 0 : i64, scratch_operands = 0 : i64, tpu.core_type = #tpu.core_type<tc>} {
    %c0 = arith.constant 0 : index
    %c0_0 = arith.constant 0 : index
    %c0_1 = arith.constant 0 : index
    %0 = vector.load %arg0[%c0, %c0_0, %c0_1] : memref<2x8x32xf32, #tpu.memory_space<vmem>>, vector<2x8x32xf32>
    %c0_2 = arith.constant 0 : index
    %c0_3 = arith.constant 0 : index
    %c0_4 = arith.constant 0 : index
    %1 = vector.load %arg1[%c0_2, %c0_3, %c0_4] : memref<1x8x32xf32, #tpu.memory_space<vmem>>, vector<1x8x32xf32>
    %2 = vector.broadcast %1 : vector<1x8x32xf32> to vector<2x8x32xf32>
    %3 = arith.addf %0, %2 : vector<2x8x32xf32>
    %c0_5 = arith.constant 0 : index
    %c0_6 = arith.constant 0 : index
    %c0_7 = arith.constant 0 : index
    %4 = vector.load %arg2[%c0_5, %c0_6, %c0_7] : memref<2x8x32xf32, #tpu.memory_space<vmem>>, vector<2x8x32xf32>
    tpu.vector_store %arg2[%c0_5, %c0_6, %c0_7], %3 {strides = array<i32>} : memref<2x8x32xf32, #tpu.memory_space<vmem>>, vector<2x8x32xf32>,
    return
  }
}

</mosaic_0001>

<bundles_post_ra>
// kernel: tpu_custom_call.1
= control target key start
LH: loop header
LB: loop body
LE: loop exit
PB: predicated region body
PF: predicated region fallthrough
CT: control target
= control target key end

     0   :  { %7 = vsyncpa [#allocation3], 0  ;;  %s203_s0 = inlined_call_operand.hbm [shape: f32[2,8,32], index: 0, kind: input, shape index: {}]   ;;  %s204_s1 = inlined_call_operand.hbm [shape: f32[1,8,32], index: 1, kind: input, shape index: {}]   ;;  %s205_s2 = inlined_call_operand.hbm [shape: f32[2,8,32], index: 2, kind: output, shape index: {}]  }
   0x1   :  { %8 = vsyncpa [#allocation6], 0 }
   0x2   :  { %9 = vsyncpa [#allocation4], 0  ;;  %s141_s9 = smov [#allocation2]   ;;  %s69_s13 = scalar_lea.hbm %s203_s0, 256 }
   0x3   :  { %s15_s10 = sshll.u32 %s141_s9, 4  ;;  %p70_p0 = scmp.ne.s32.totalorder %s203_s0, %s69_s13  ;;  %s16_s10 = int_to_ptr.vmem [resolvable:$true] %s15_s10 }
   0x4   :  { %p73_p1 = scmp.lt.u32.totalorder %s69_s13, %s203_s0 }
   0x6   :  { %p75_p2 = pnand %p73_p1, %p70_p0 }
   0x8   :  { %78 = shalt.err (!%p75_p2)
}
   0x9   :  { %s79_s18 = scalar_lea.vmem %s16_s10, 256  ;;  %p84_p4 = scmp.lt.s32.totalorder %s16_s10, %s16_s10 }
   0xa   :  { %p80_p3 = scmp.ne.s32.totalorder %s16_s10, %s79_s18  ;;  %p85_p5 = scmp.lt.s32.totalorder %s79_s18, %s79_s18 }
   0xc   :  { %p86_p6 = por %p85_p5, %p84_p4 }
   0xe   :  { %p87_p7 = pnand %p86_p6, %p80_p3 }
  0x10   :  { %90 = shalt.err (!%p87_p7)
}
  0x11   :  { %s142_s19 = smov 128   ;;  %s143_s20 = smov 8  }
  0x12   :  { %21 = dma.hbm_to_vmem [thread:$0]  %s203_s0, 256, %s16_s10, [#allocation3], %s142_s19, %s142_s19, %s143_s20  }
  0x13   :  { %s144_s23 = smov [#allocation5]   ;;  %s91_s27 = scalar_lea.hbm %s204_s1, 128 }
  0x14   :  { %s28_s24 = sshll.u32 %s144_s23, 4  ;;  %p92_p8 = scmp.ne.s32.totalorder %s204_s1, %s91_s27  ;;  %s29_s24 = int_to_ptr.vmem [resolvable:$true] %s28_s24 }
  0x15   :  { %p95_p9 = scmp.lt.u32.totalorder %s91_s27, %s204_s1 }
  0x17   :  { %p97_p10 = pnand %p95_p9, %p92_p8 }
  0x19   :  { %100 = shalt.err (!%p97_p10)
}
  0x1a   :  { %s101_s4 = scalar_lea.vmem %s29_s24, 128  ;;  %p106_p12 = scmp.lt.s32.totalorder %s29_s24, %s29_s24 }
  0x1b   :  { %p102_p11 = scmp.ne.s32.totalorder %s29_s24, %s101_s4  ;;  %p107_p13 = scmp.lt.s32.totalorder %s101_s4, %s101_s4 }
  0x1d   :  { %p108_p0 = por %p107_p13, %p106_p12 }
  0x1f   :  { %p109_p1 = pnand %p108_p0, %p102_p11 }
  0x21   :  { %112 = shalt.err (!%p109_p1)
}
  0x22   :  { %31 = dma.hbm_to_vmem [thread:$0]  %s204_s1, 128, %s29_s24, [#allocation6]  }
  0x23   :  { %135 = dma.done.wait [#allocation3], 256  }
  0x24   :  { %136 = vsyncadd [#allocation3], 4294967040 }
  0x25   :  { %137 = dma.done.wait [#allocation6], 128  }
  0x26   :  { %138 = vsyncadd [#allocation6], 4294967168  ;;  %s145_s6 = smov [#allocation7]   ;;  %v38_v0 = vld [vmem:[#allocation2] sm:$0xff]  ;;  %v40_v1 = vld [vmem:[#allocation5] sm:$0xff]  ;;  %vm43_vm0 = vcmask 261120  }
  0x27   :  { %s51_s7 = sshll.u32 %s145_s6, 4  ;;  %v39_v2 = vld [vmem:[#allocation2 + $0x8] sm:$0xff]  ;;  %v41_v3 = vadd.f32 %v40_v1, %v38_v0  ;;  %s52_s7 = int_to_ptr.vmem [resolvable:$true] %s51_s7 }
  0x28   :  { %v42_v4 = vadd.f32 %v40_v1, %v39_v2  ;;  %s113_s8 = scalar_lea.vmem %s52_s7, 256  ;;  %p118_p3 = scmp.lt.s32.totalorder %s52_s7, %s52_s7 }
  0x29   :  { %44 = vst.msk [vmem:[#allocation7] sm:$0xff] %vm43_vm0, %v41_v3  ;;  %p114_p2 = scmp.ne.s32.totalorder %s52_s7, %s113_s8  ;;  %p119_p4 = scmp.lt.s32.totalorder %s113_s8, %s113_s8 }
  0x2a   :  { %45 = vst.msk [vmem:[#allocation7 + $0x8] sm:$0xff] %vm43_vm0, %v42_v4 }
  0x2b   :  { %p120_p5 = por %p119_p4, %p118_p3 }
  0x2d   :  { %p121_p6 = pnand %p120_p5, %p114_p2 }
  0x2f   :  { %124 = shalt.err (!%p121_p6)
}
  0x30   :  { %s125_s10 = scalar_lea.hbm %s205_s2, 256 }
  0x31   :  { %p126_p7 = scmp.ne.s32.totalorder %s205_s2, %s125_s10  ;;  %p129_p8 = scmp.lt.u32.totalorder %s125_s10, %s205_s2 }
  0x33   :  { %p131_p9 = pnand %p129_p8, %p126_p7 }
  0x35   :  { %134 = shalt.err (!%p131_p9)
}
  0x36   :  { %57 = dma.vmem_to_hbm [thread:$0]  %s52_s7, 256, %s205_s2, [#allocation4], %s142_s19, %s142_s19, %s143_s20  }
  0x37   :  { %139 = dma.done.wait [#allocation4], 256  }
  0x38   :  { %140 = vsyncadd [#allocation4], 4294967040 }
  0x39   :  { %61 = vsyncpa [#allocation3], 1 }
  0x3a   :  { %62 = vsyncpa [#allocation6], 1 }
  0x3b   :  { %63 = vsyncpa [#allocation4], 1 }

</bundles_post_ra>
